<compile_context>
chip_gen: v6e
topology: v6e:2x2x1
jax: 0.10.0
libtpu: 0.0.40
codegen_flags: <defaults>
</compile_context>

<pallas_src>
import functools

import jax
import jax.numpy as jnp
from jax.experimental import pallas as pl
from jax.experimental.pallas import tpu as pltpu


# --------------------------------- kernel ------------------------------------

def mha_kernel(num_heads, batch_block, mxu_dtype,
               x_ref, wq_ref, wk_ref, wv_ref, bq_ref, bk_ref, bv_ref,
               wp_ref, bp_ref, kmask_ref, sumblk_ref, o_ref):
    # x_ref:      (bb, S, E) f32 activations for `bb` batch elements
    # wq/wk/wv:   (E, E)     per-projection weights, head-major output columns
    # bq/bk/bv:   (1, E)     biases (f32)
    # wp_ref:     (E, E)     projection weight with 1/sqrt(E) folded in
    # bp_ref:     (1, E)     projection bias (f32)
    # kmask_ref:  (H*S, E)   f32 0/1 block mask: row h*S+j keeps head-h columns
    # sumblk_ref: (H*S, H*S) block-diagonal ones (mxu_dtype)
    # o_ref:      (bb, S, E) output
    bb, S, E = x_ref.shape
    H = num_heads
    HS = H * S

    x = x_ref[...].reshape(bb * S, E).astype(mxu_dtype)

    # Three lane-aligned matmuls (no column slicing of a fused 3E tile).
    q = jnp.dot(x, wq_ref[...], preferred_element_type=jnp.float32) + bq_ref[...]
    k = jnp.dot(x, wk_ref[...], preferred_element_type=jnp.float32) + bk_ref[...]
    v = jnp.dot(x, wv_ref[...], preferred_element_type=jnp.float32) + bv_ref[...]

    kmask = kmask_ref[...]        # (HS, E) f32, constant input
    sumblk = sumblk_ref[...]      # (HS, HS) mxu_dtype, constant input

    dn_nt = (((1,), (1,)), ((), ()))   # contract feature dims: (S,E)x(HS,E)->(S,HS)

    outs = []
    for b in range(bb):            # static; bb is small (1 at the test shape)
        r = slice(b * S, (b + 1) * S)
        qb = q[r].astype(mxu_dtype)                                    # (S, E)
        # Head-stacked keys/values: row h*S+j holds k[j]/v[j] restricted to the
        # channels of head h (f32 mask multiply, cast only at the dot boundary).
        k_stack = (jnp.broadcast_to(k[r][None], (H, S, E)).reshape(HS, E)
                   * kmask).astype(mxu_dtype)                          # (HS, E)
        v_stack = (jnp.broadcast_to(v[r][None], (H, S, E)).reshape(HS, E)
                   * kmask).astype(mxu_dtype)                          # (HS, E)

        # One lane-dense energy matmul: column h*S+j is head h, key j.
        energy = jax.lax.dot_general(qb, k_stack, dn_nt,
                                     preferred_element_type=jnp.float32)  # (S, HS)

        # Segmented (per-head) max for stability, broadcast back lane-dense.
        emax = jnp.max(energy.reshape(S, H, S), axis=-1, keepdims=True)   # (S,H,1)
        emax = jnp.broadcast_to(emax, (S, H, S)).reshape(S, HS)
        ee = jnp.exp(energy - emax)                                       # dense (S,HS)

        # Per-head denominator via block-diagonal ones matmul (MXU has slack);
        # the broadcast back across the head's lanes is implicit in the matmul.
        den = jnp.dot(ee.astype(mxu_dtype), sumblk,
                      preferred_element_type=jnp.float32)                 # (S, HS)
        att = ee * pl.reciprocal(den, approx=True)   # softmax; /sqrt(E) folded in wp
        # TODO(synk): att_drop (nn.Dropout) is identity at dropout=0; mask=None
        # energy masking path not emitted (module defaults).

        outs.append(jnp.dot(att.astype(mxu_dtype), v_stack,
                            preferred_element_type=jnp.float32))          # (S, E)

    attn_out = outs[0] if bb == 1 else jnp.concatenate(outs, axis=0)      # (bb*S, E)

    proj = (jnp.dot(attn_out.astype(mxu_dtype), wp_ref[...],
                    preferred_element_type=jnp.float32) + bp_ref[...])
    o_ref[...] = proj.reshape(bb, S, E)


# -------------------------------- wrapper ------------------------------------

def multi_head_attention(x, wqkv_t, bqkv_t, wp_t, bp_t, *, num_heads,
                         mxu_dtype=jnp.bfloat16, batch_block=None):
    """Pallas MultiHeadAttention forward.

    x:       (B, S, E) float32
    wqkv_t:  (3E, E)   torch nn.Linear weight; output features ordered (h, d, qkv)
    bqkv_t:  (3E,)     torch nn.Linear bias (same ordering)
    wp_t:    (E, E)    projection nn.Linear weight
    bp_t:    (E,)      projection nn.Linear bias
    """
    B, S, E = x.shape
    H = num_heads
    D = E // H
    HS = H * S

    # Fold batch into sublanes, but keep >=2 grid steps when B >= 2 so that
    # v7x's two TensorCores both get a step (single-TC chips just loop).
    if batch_block is None:
        batch_block = B // 2 if (B >= 2 and B % 2 == 0) else 1
    bb = batch_block
    assert B % bb == 0, (B, bb)
    grid = (B // bb,)

    # ---- plain-JAX weight prep (runs once, outside the kernel) ----
    # torch Linear computes x @ W.T; split the interleaved (h, d, qkv) output
    # features into three head-major (E, E) weights + (1, E) biases.
    w_all = wqkv_t.T.reshape(E, H, D, 3)        # (in, h, d, qkv)
    b_all = bqkv_t.reshape(H, D, 3)
    wq, wk, wv = (w_all[..., i].reshape(E, E) for i in range(3))
    bq, bk, bv = (b_all[..., i].reshape(1, E) for i in range(3))
    # Fold the reference's post-softmax 1/sqrt(E) into the projection weight
    # (exact: the scalar commutes with att @ v and the projection matmul).
    wp = wp_t.T * (1.0 / jnp.sqrt(jnp.float32(E)))
    bp = bp_t.reshape(1, E)

    # Constant head masks (passed as inputs with constant index_map, not
    # rebuilt from iota every grid step).
    row_head = jnp.arange(HS, dtype=jnp.int32) // S
    col_head = jnp.arange(E, dtype=jnp.int32) // D
    kmask = (row_head[:, None] == col_head[None, :]).astype(jnp.float32)   # (HS, E)
    sumblk = (row_head[:, None] == row_head[None, :]).astype(mxu_dtype)    # (HS, HS)

    const = lambda i: (0, 0)
    kernel = functools.partial(mha_kernel, H, bb, mxu_dtype)

    flops = B * (3 * 2 * S * E * E          # q, k, v projections
                 + 2 * S * HS * E           # energy
                 + 2 * S * HS * HS          # block-diag denominator
                 + 2 * S * HS * E           # att @ V_stack
                 + 2 * S * E * E)           # output projection
    bytes_accessed = (4 * 2 * B * S * E                       # x in, out
                      + 4 * (4 * E * E + 4 * E)               # weights + biases
                      + 4 * HS * E + 2 * HS * HS)             # masks
    cost = pl.CostEstimate(flops=flops, transcendentals=B * S * HS,
                           bytes_accessed=int(bytes_accessed))

    return pl.pallas_call(
        kernel,
        grid=grid,
        in_specs=[pl.BlockSpec((bb, S, E), lambda i: (i, 0, 0)),
                  pl.BlockSpec((E, E), const), pl.BlockSpec((E, E), const),
                  pl.BlockSpec((E, E), const),
                  pl.BlockSpec((1, E), const), pl.BlockSpec((1, E), const),
                  pl.BlockSpec((1, E), const),
                  pl.BlockSpec((E, E), const), pl.BlockSpec((1, E), const),
                  pl.BlockSpec((HS, E), const), pl.BlockSpec((HS, HS), const)],
        out_specs=pl.BlockSpec((bb, S, E), lambda i: (i, 0, 0)),
        out_shape=jax.ShapeDtypeStruct((B, S, E), jnp.float32),
        compiler_params=pltpu.CompilerParams(
            dimension_semantics=("parallel",)),   # shards grid steps across TCs on v7x
        cost_estimate=cost,
    )(x,
      wq.astype(mxu_dtype), wk.astype(mxu_dtype), wv.astype(mxu_dtype),
      bq.astype(jnp.float32), bk.astype(jnp.float32), bv.astype(jnp.float32),
      wp.astype(mxu_dtype), bp.astype(jnp.float32),
      kmask, sumblk)


# ----------------------- pure-JAX reference (for checking) -------------------

def mha_reference(x, wqkv_t, bqkv_t, wp_t, bp_t, *, num_heads):
    B, S, E = x.shape
    H = num_heads
    D = E // H
    qkv = jnp.einsum('bse,fe->bsf', x, wqkv_t) + bqkv_t          # torch Linear
    qkv = qkv.reshape(B, S, H, D, 3).transpose(4, 0, 2, 1, 3)    # (3, B, H, S, D)
    q, k, v = qkv[0], qkv[1], qkv[2]
    energy = jnp.einsum('bhqd,bhkd->bhqk', q, k)
    att = jax.nn.softmax(energy, axis=-1) / (E ** 0.5)           # scale AFTER softmax
    out = jnp.einsum('bhal,bhlv->bhav', att, v)
    out = out.transpose(0, 2, 1, 3).reshape(B, S, E)             # 'b h n d -> b n (h d)'
    return jnp.einsum('bse,fe->bsf', out, wp_t) + bp_t


# ---------------------------------- main -------------------------------------

if __name__ == "__main__":
    B, S, E, H = 2, 16, 32, 8

    key = jax.random.PRNGKey(0)
    kx, k1, k2, k3, k4 = jax.random.split(key, 5)
    std = 0.1
    x = jax.random.normal(kx, (B, S, E), jnp.float32)
    wqkv_t = std * jax.random.normal(k1, (3 * E, E), jnp.float32)
    bqkv_t = std * jax.random.normal(k2, (3 * E,), jnp.float32)
    wp_t = std * jax.random.normal(k3, (E, E), jnp.float32)
    bp_t = std * jax.random.normal(k4, (E,), jnp.float32)

    out = multi_head_attention(x, wqkv_t, bqkv_t, wp_t, bp_t, num_heads=H)
    out = jax.block_until_ready(out)

    ref = mha_reference(x, wqkv_t, bqkv_t, wp_t, bp_t, num_heads=H)
    assert out.shape == (B, S, E), out.shape
    assert bool(jnp.all(jnp.isfinite(out)))
    err = float(jnp.max(jnp.abs(out - ref)))
    # bf16 MXU operands + approx reciprocal -> small, bounded deviation from fp32 ref.
    assert err < 5e-2, f"max abs err {err}"
    print("KERNEL_OK")
</pallas_src>

<mosaic_0001>
module attributes {stable_mosaic.version = 11 : i64} {
  func.func @mha_kernel(%arg0: i32, %arg1: memref<1x16x32xf32, #tpu.memory_space<vmem>>, %arg2: memref<32x32xbf16, #tpu.memory_space<vmem>>, %arg3: memref<32x32xbf16, #tpu.memory_space<vmem>>, %arg4: memref<32x32xbf16, #tpu.memory_space<vmem>>, %arg5: memref<1x32xf32, #tpu.memory_space<vmem>>, %arg6: memref<1x32xf32, #tpu.memory_space<vmem>>, %arg7: memref<1x32xf32, #tpu.memory_space<vmem>>, %arg8: memref<32x32xbf16, #tpu.memory_space<vmem>>, %arg9: memref<1x32xf32, #tpu.memory_space<vmem>>, %arg10: memref<128x32xf32, #tpu.memory_space<vmem>>, %arg11: memref<128x128xbf16, #tpu.memory_space<vmem>>, %arg12: memref<1x16x32xf32, #tpu.memory_space<vmem>>) attributes {dimension_semantics = [#tpu.dimension_semantics<parallel>], iteration_bounds = array<i64: 2>, scalar_prefetch = 0 : i64, scratch_operands = 0 : i64, tpu.core_type = #tpu.core_type<tc>, window_params = [{transform_indices = @transform_0, window_bounds = array<i64: 1, 16, 32>}, {pipeline_mode = #tpu.pipeline_mode<synchronous>, transform_indices = @transform_1, window_bounds = array<i64: 32, 32>}, {pipeline_mode = #tpu.pipeline_mode<synchronous>, transform_indices = @transform_2, window_bounds = array<i64: 32, 32>}, {pipeline_mode = #tpu.pipeline_mode<synchronous>, transform_indices = @transform_3, window_bounds = array<i64: 32, 32>}, {pipeline_mode = #tpu.pipeline_mode<synchronous>, transform_indices = @transform_4, window_bounds = array<i64: 1, 32>}, {pipeline_mode = #tpu.pipeline_mode<synchronous>, transform_indices = @transform_5, window_bounds = array<i64: 1, 32>}, {pipeline_mode = #tpu.pipeline_mode<synchronous>, transform_indices = @transform_6, window_bounds = array<i64: 1, 32>}, {pipeline_mode = #tpu.pipeline_mode<synchronous>, transform_indices = @transform_7, window_bounds = array<i64: 32, 32>}, {pipeline_mode = #tpu.pipeline_mode<synchronous>, transform_indices = @transform_8, window_bounds = array<i64: 1, 32>}, {pipeline_mode = #tpu.pipeline_mode<synchronous>, transform_indices = @transform_9, window_bounds = array<i64: 128, 32>}, {pipeline_mode = #tpu.pipeline_mode<synchronous>, transform_indices = @transform_10, window_bounds = array<i64: 128, 128>}, {transform_indices = @transform_11, window_bounds = array<i64: 1, 16, 32>}]} {
    %c0 = arith.constant 0 : index
    %c0_0 = arith.constant 0 : index
    %c0_1 = arith.constant 0 : index
    %0 = vector.load %arg1[%c0, %c0_0, %c0_1] : memref<1x16x32xf32, #tpu.memory_space<vmem>>, vector<1x16x32xf32>
    %1 = vector.shape_cast %0 : vector<1x16x32xf32> to vector<16x32xf32>
    %2 = arith.truncf %1 : vector<16x32xf32> to vector<16x32xbf16>
    %c0_2 = arith.constant 0 : index
    %c0_3 = arith.constant 0 : index
    %3 = vector.load %arg2[%c0_2, %c0_3] : memref<32x32xbf16, #tpu.memory_space<vmem>>, vector<32x32xbf16>
    %cst = arith.constant dense<0.000000e+00> : vector<16x32xf32>
    %4 = tpu.matmul %2, %3, %cst {dimension_numbers = #tpu.dot_dimension_numbers<[1], [0], [0], [1], [0, 0, 1, 1], [], []>} : vector<16x32xbf16>, vector<32x32xbf16>, vector<16x32xf32> -> vector<16x32xf32>
    %c0_4 = arith.constant 0 : index
    %c0_5 = arith.constant 0 : index
    %5 = vector.load %arg5[%c0_4, %c0_5] : memref<1x32xf32, #tpu.memory_space<vmem>>, vector<1x32xf32>
    %6 = vector.broadcast %5 : vector<1x32xf32> to vector<16x32xf32>
    %7 = arith.addf %4, %6 : vector<16x32xf32>
    %c0_6 = arith.constant 0 : index
    %c0_7 = arith.constant 0 : index
    %8 = vector.load %arg3[%c0_6, %c0_7] : memref<32x32xbf16, #tpu.memory_space<vmem>>, vector<32x32xbf16>
    %cst_8 = arith.constant dense<0.000000e+00> : vector<16x32xf32>
    %9 = tpu.matmul %2, %8, %cst_8 {dimension_numbers = #tpu.dot_dimension_numbers<[1], [0], [0], [1], [0, 0, 1, 1], [], []>} : vector<16x32xbf16>, vector<32x32xbf16>, vector<16x32xf32> -> vector<16x32xf32>
    %c0_9 = arith.constant 0 : index
    %c0_10 = arith.constant 0 : index
    %10 = vector.load %arg6[%c0_9, %c0_10] : memref<1x32xf32, #tpu.memory_space<vmem>>, vector<1x32xf32>
    %11 = vector.broadcast %10 : vector<1x32xf32> to vector<16x32xf32>
    %12 = arith.addf %9, %11 : vector<16x32xf32>
    %c0_11 = arith.constant 0 : index
    %c0_12 = arith.constant 0 : index
    %13 = vector.load %arg4[%c0_11, %c0_12] : memref<32x32xbf16, #tpu.memory_space<vmem>>, vector<32x32xbf16>
    %cst_13 = arith.constant dense<0.000000e+00> : vector<16x32xf32>
    %14 = tpu.matmul %2, %13, %cst_13 {dimension_numbers = #tpu.dot_dimension_numbers<[1], [0], [0], [1], [0, 0, 1, 1], [], []>} : vector<16x32xbf16>, vector<32x32xbf16>, vector<16x32xf32> -> vector<16x32xf32>
    %c0_14 = arith.constant 0 : index
    %c0_15 = arith.constant 0 : index
    %15 = vector.load %arg7[%c0_14, %c0_15] : memref<1x32xf32, #tpu.memory_space<vmem>>, vector<1x32xf32>
    %16 = vector.broadcast %15 : vector<1x32xf32> to vector<16x32xf32>
    %17 = arith.addf %14, %16 : vector<16x32xf32>
    %c0_16 = arith.constant 0 : index
    %c0_17 = arith.constant 0 : index
    %18 = vector.load %arg10[%c0_16, %c0_17] : memref<128x32xf32, #tpu.memory_space<vmem>>, vector<128x32xf32>
    %c0_18 = arith.constant 0 : index
    %c0_19 = arith.constant 0 : index
    %19 = vector.load %arg11[%c0_18, %c0_19] : memref<128x128xbf16, #tpu.memory_space<vmem>>, vector<128x128xbf16>
    %20 = arith.truncf %7 : vector<16x32xf32> to vector<16x32xbf16>
    %21 = vector.shape_cast %12 : vector<16x32xf32> to vector<1x16x32xf32>
    %22 = vector.shape_cast %21 : vector<1x16x32xf32> to vector<1x16x32xf32>
    %23 = vector.broadcast %22 : vector<1x16x32xf32> to vector<8x16x32xf32>
    %24 = vector.shape_cast %23 : vector<8x16x32xf32> to vector<128x32xf32>
    %25 = arith.mulf %24, %18 : vector<128x32xf32>
    %26 = arith.truncf %25 : vector<128x32xf32> to vector<128x32xbf16>
    %27 = vector.shape_cast %17 : vector<16x32xf32> to vector<1x16x32xf32>
    %28 = vector.shape_cast %27 : vector<1x16x32xf32> to vector<1x16x32xf32>
    %29 = vector.broadcast %28 : vector<1x16x32xf32> to vector<8x16x32xf32>
    %30 = vector.shape_cast %29 : vector<8x16x32xf32> to vector<128x32xf32>
    %31 = arith.mulf %30, %18 : vector<128x32xf32>
    %32 = arith.truncf %31 : vector<128x32xf32> to vector<128x32xbf16>
    %cst_20 = arith.constant dense<0.000000e+00> : vector<16x128xf32>
    %33 = tpu.matmul %20, %26, %cst_20 {dimension_numbers = #tpu.dot_dimension_numbers<[1], [1], [0], [0], [0, 0, 1, 0], [], []>} : vector<16x32xbf16>, vector<128x32xbf16>, vector<16x128xf32> -> vector<16x128xf32>
    %34 = vector.shape_cast %33 : vector<16x128xf32> to vector<16x8x16xf32>
    %cst_21 = arith.constant dense<0xFF800000> : vector<16x8xf32>
    %35 = vector.multi_reduction <maximumf>, %34, %cst_21 [2] : vector<16x8x16xf32> to vector<16x8xf32>
    %36 = vector.shape_cast %35 : vector<16x8xf32> to vector<16x8x1xf32>
    %37 = vector.shape_cast %36 : vector<16x8x1xf32> to vector<16x8x1xf32>
    %38 = vector.broadcast %37 : vector<16x8x1xf32> to vector<16x8x16xf32>
    %39 = vector.shape_cast %38 : vector<16x8x16xf32> to vector<16x128xf32>
    %40 = arith.subf %33, %39 : vector<16x128xf32>
    %41 = math.exp %40 : vector<16x128xf32>
    %42 = arith.truncf %41 : vector<16x128xf32> to vector<16x128xbf16>
    %cst_22 = arith.constant dense<0.000000e+00> : vector<16x128xf32>
    %43 = tpu.matmul %42, %19, %cst_22 {dimension_numbers = #tpu.dot_dimension_numbers<[1], [0], [0], [1], [0, 0, 1, 1], [], []>} : vector<16x128xbf16>, vector<128x128xbf16>, vector<16x128xf32> -> vector<16x128xf32>
    %44 = tpu.reciprocal %43 {approx = true} : vector<16x128xf32> -> vector<16x128xf32>
    %45 = arith.mulf %41, %44 : vector<16x128xf32>
    %46 = arith.truncf %45 : vector<16x128xf32> to vector<16x128xbf16>
    %cst_23 = arith.constant dense<0.000000e+00> : vector<16x32xf32>
    %47 = tpu.matmul %46, %32, %cst_23 {dimension_numbers = #tpu.dot_dimension_numbers<[1], [0], [0], [1], [0, 0, 1, 1], [], []>} : vector<16x128xbf16>, vector<128x32xbf16>, vector<16x32xf32> -> vector<16x32xf32>
    %48 = arith.truncf %47 : vector<16x32xf32> to vector<16x32xbf16>
    %c0_24 = arith.constant 0 : index
    %c0_25 = arith.constant 0 : index
    %49 = vector.load %arg8[%c0_24, %c0_25] : memref<32x32xbf16, #tpu.memory_space<vmem>>, vector<32x32xbf16>
    %cst_26 = arith.constant dense<0.000000e+00> : vector<16x32xf32>
    %50 = tpu.matmul %48, %49, %cst_26 {dimension_numbers = #tpu.dot_dimension_numbers<[1], [0], [0], [1], [0, 0, 1, 1], [], []>} : vector<16x32xbf16>, vector<32x32xbf16>, vector<16x32xf32> -> vector<16x32xf32>
    %c0_27 = arith.constant 0 : index
    %c0_28 = arith.constant 0 : index
    %51 = vector.load %arg9[%c0_27, %c0_28] : memref<1x32xf32, #tpu.memory_space<vmem>>, vector<1x32xf32>
    %52 = vector.broadcast %51 : vector<1x32xf32> to vector<16x32xf32>
    %53 = arith.addf %50, %52 : vector<16x32xf32>
    %54 = vector.shape_cast %53 : vector<16x32xf32> to vector<1x16x32xf32>
    %c0_29 = arith.constant 0 : index
    %c0_30 = arith.constant 0 : index
    %c0_31 = arith.constant 0 : index
    %55 = vector.load %arg12[%c0_29, %c0_30, %c0_31] : memref<1x16x32xf32, #tpu.memory_space<vmem>>, vector<1x16x32xf32>
    tpu.vector_store %arg12[%c0_29, %c0_30, %c0_31], %54 {strides = array<i32>} : memref<1x16x32xf32, #tpu.memory_space<vmem>>, vector<1x16x32xf32>,
    return
  }
  func.func @transform_0(%arg0: i32) -> (i32, i32, i32) {
    %c0_i32 = arith.constant 0 : i32
    %c0_i32_0 = arith.constant 0 : i32
    %c0_i32_1 = arith.constant 0 : i32
    return %arg0, %c0_i32, %c0_i32_0 : i32, i32, i32
  }
  func.func @transform_1(%arg0: i32) -> (i32, i32) {
    %c0_i32 = arith.constant 0 : i32
    %c0_i32_0 = arith.constant 0 : i32
    %c0_i32_1 = arith.constant 0 : i32
    return %c0_i32, %c0_i32_0 : i32, i32
  }
  func.func @transform_2(%arg0: i32) -> (i32, i32) {
    %c0_i32 = arith.constant 0 : i32
    %c0_i32_0 = arith.constant 0 : i32
    %c0_i32_1 = arith.constant 0 : i32
    return %c0_i32, %c0_i32_0 : i32, i32
  }
  func.func @transform_3(%arg0: i32) -> (i32, i32) {
    %c0_i32 = arith.constant 0 : i32
    %c0_i32_0 = arith.constant 0 : i32
    %c0_i32_1 = arith.constant 0 : i32
    return %c0_i32, %c0_i32_0 : i32, i32
  }
  func.func @transform_4(%arg0: i32) -> (i32, i32) {
    %c0_i32 = arith.constant 0 : i32
    %c0_i32_0 = arith.constant 0 : i32
    %c0_i32_1 = arith.constant 0 : i32
    return %c0_i32, %c0_i32_0 : i32, i32
  }
  func.func @transform_5(%arg0: i32) -> (i32, i32) {
    %c0_i32 = arith.constant 0 : i32
    %c0_i32_0 = arith.constant 0 : i32
    %c0_i32_1 = arith.constant 0 : i32
    return %c0_i32, %c0_i32_0 : i32, i32
  }
  func.func @transform_6(%arg0: i32) -> (i32, i32) {
    %c0_i32 = arith.constant 0 : i32
    %c0_i32_0 = arith.constant 0 : i32
    %c0_i32_1 = arith.constant 0 : i32
    return %c0_i32, %c0_i32_0 : i32, i32
  }
  func.func @transform_7(%arg0: i32) -> (i32, i32) {
    %c0_i32 = arith.constant 0 : i32
    %c0_i32_0 = arith.constant 0 : i32
    %c0_i32_1 = arith.constant 0 : i32
    return %c0_i32, %c0_i32_0 : i32, i32
  }
  func.func @transform_8(%arg0: i32) -> (i32, i32) {
    %c0_i32 = arith.constant 0 : i32
    %c0_i32_0 = arith.constant 0 : i32
    %c0_i32_1 = arith.constant 0 : i32
    return %c0_i32, %c0_i32_0 : i32, i32
  }
  func.func @transform_9(%arg0: i32) -> (i32, i32) {
    %c0_i32 = arith.constant 0 : i32
    %c0_i32_0 = arith.constant 0 : i32
    %c0_i32_1 = arith.constant 0 : i32
    return %c0_i32, %c0_i32_0 : i32, i32
  }
  func.func @transform_10(%arg0: i32) -> (i32, i32) {
    %c0_i32 = arith.constant 0 : i32
    %c0_i32_0 = arith.constant 0 : i32
    %c0_i32_1 = arith.constant 0 : i32
    return %c0_i32, %c0_i32_0 : i32, i32
  }
  func.func @transform_11(%arg0: i32) -> (i32, i32, i32) {
    %c0_i32 = arith.constant 0 : i32
    %c0_i32_0 = arith.constant 0 : i32
    %c0_i32_1 = arith.constant 0 : i32
    return %arg0, %c0_i32, %c0_i32_0 : i32, i32, i32
  }
}

</mosaic_0001>

<bundles_post_ra>
// kernel: tpu_custom_call.1
= control target key start
LH: loop header
LB: loop body
LE: loop exit
PB: predicated region body
PF: predicated region fallthrough
CT: control target
= control target key end

     0   :  { %s2680_s0 = inlined_call_operand.vmem [shape: f32[2,16,32], index: 0, kind: input, shape index: {}]   ;;  %s2681_s1 = inlined_call_operand.vmem [shape: bf16[32,32], index: 1, kind: input, shape index: {}]   ;;  %s2682_s2 = inlined_call_operand.vmem [shape: bf16[32,32], index: 2, kind: input, shape index: {}]   ;;  %s2683_s3 = inlined_call_operand.vmem [shape: bf16[32,32], index: 3, kind: input, shape index: {}]   ;;  %s2684_s4 = inlined_call_operand.vmem [shape: f32[1,32], index: 4, kind: input, shape index: {}]   ;;  %s2685_s5 = inlined_call_operand.vmem [shape: f32[1,32], index: 5, kind: input, shape index: {}]   ;;  %s2686_s6 = inlined_call_operand.vmem [shape: f32[1,32], index: 6, kind: input, shape index: {}]   ;;  %s2687_s7 = inlined_call_operand.vmem [shape: bf16[32,32], index: 7, kind: input, shape index: {}]   ;;  %s2688_s8 = inlined_call_operand.vmem [shape: f32[1,32], index: 8, kind: input, shape index: {}]   ;;  %s2689_s9 = inlined_call_operand.vmem [shape: f32[128,32], index: 9, kind: input, shape index: {}]   ;;  %s2690_s10 = inlined_call_operand.vmem [shape: bf16[128,128], index: 10, kind: input, shape index: {}]   ;;  %s2691_s11 = inlined_call_operand.hbm [shape: f32[2,16,32], index: 11, kind: output, shape index: {}]  }
   0x1   :  { %2694 = sst [smem:[#allocation5_spill]] %s2680_s0 }
   0x2   :  { %16 = vsyncpa [#allocation3], 0 }
   0x3   :  { %18 = vsyncpa [#allocation3 + $0x1], 0  ;;  %s2116_s17 = smov 0   ;;  %s2118_s18 = smov 0  }
   0x4   :  { %s2120_s19 = smov 0   ;;  %s2122_s20 = smov 0  }
   0x5 LB: > { %s2137_s21 = sadd.s32 4294967295, %s2040_s20   ;;  %s1734_s22 = sadd.s32 4294967294, %s2040_s20   ;;  %s2040_s20 = sphi %s2122_s20, %s2702_s20   ;;  %s2036_s19 = sphi %s2120_s19, %s2701_s19   ;;  %s2032_s18 = sphi %s2118_s18, %s2700_s18   ;;  %s2028_s17 = sphi %s2116_s17, %s2699_s17  }
   0x6   : > { %s2141_s23 = sadd.s32 1, %s2040_s20   ;;  %s267_s24 = sadd.s32 1, %s2036_s19 }
   0x7   : > { %s264_s25 = ssub.s32 %s2040_s20, %s2141_s23  ;;  %p277_p0 = scmp.ne.s32.totalorder %s2036_s19, %s2032_s18 }
   0x8   : > { %p265_p1 = scmp.eq.s32.totalorder %s264_s25, 0  ;;  %p278_p2 = scmp.eq.s32.totalorder %s2137_s21, 1 }
   0x9   : > { %p283_p3 = scmp.ne.s32.totalorder %s2032_s18, %s2028_s17  ;;  %p284_p4 = scmp.eq.s32.totalorder %s1734_s22, 1 }
   0xa   : > { %s2152_s26 = scalar_select %p265_p1, %s2036_s19, %s267_s24  }
   0xb   : > { %p2154_p5 = por %p278_p2, %p277_p0  ;;  %p2158_p6 = por %p284_p4, %p283_p3 }
   0xc   : > { %p1737_p7 = scmp.ge.s32.totalorder %s2040_s20, 1  ;;  %p340_p8 = scmp.lt.s32.totalorder %s2040_s20, 3 }
   0xe   : > { %p341_p9 = pnand %p1737_p7, %p340_p8 }
   0xf   : > { %p380_p10 = scmp.lt.s32.totalorder (!%p341_p9), %s2137_s21, 1  ;;  %s2697_s0 = sld [smem:[#allocation5_spill]] (!%p341_p9) }
  0x10   : > { %344 = sbr.rel (%p341_p9) target bundleno = 1603 (0x643), region = 64  ;;  %s2692_s29 = smov (!%p341_p9), 112  }
  0x11   : > { %s2046_s30 = smov (!%p341_p9), 80   ;;  %s2048_s13 = smov (!%p341_p9), 48  }
  0x12   : > { %s2049_s14 = smov (!%p341_p9), 32   ;;  %s2050_s15 = smov (!%p341_p9), 16  }
  0x13   : > { %s1772_s22 = sshll.u32 (!%p341_p9), %s2137_s21, 8 }
  0x15   : > { %v1956_v0 = vld [vmem:[%s2682_s2 + $0x8] sm:$0xff]   ;;  %v2042_v1 = vmov 0.0   ;;  %v1957_v2 = vld [vmem:[%s2682_s2] sm:$0xff]   ;;  %vm2043_vm0 = vmmov 0   ;;  %s381_s16 = scalar_select %p380_p10, %s2137_s21, 1  ;;  %vm412_vm1 = vcmask 261120  }
  0x16   : > { %1820 = vmatprep.subr.bf16.mxu1 %v2042_v1  ;;  %1812 = vmatprep.subr.bf16.mxu0 %v2042_v1  ;;  %v1958_v3 = vld [vmem:[%s2681_s1 + $0x8] sm:$0xff]   ;;  %v1959_v4 = vld [vmem:[%s2681_s1] sm:$0xff]   ;;  %v2212_v16 = vld [vmem:[%s2689_s9 + $0x70] sm:$0xff]  ;;  %vm1050_vm2 = vcmask 130048   ;;  %vm1431_vm3 = vcmask 392192   ;;  %vm1434_vm4 = vcmask 523264  }
  0x17   : > { %1821 = vmatpush3.bf16.msra.mxu1 %v1956_v0  ;;  %1824 = vmatprep.mubr.msk.bf16.mxu1 %vm2043_vm0, %v2042_v1  ;;  %s1771_s25 = sshll.u32 %s381_s16, 4  ;;  %v1745_v8 = vld [vmem:[%s2685_s5] ss:$0 sm:$0xff]  ;;  %v2217_v17 = vld [vmem:[%s2689_s9 + $0x78] sm:$0xff]  ;;  %v2229_v26 = vld [vmem:[%s2689_s9 + $0x68] sm:$0xff]  ;;  %vm1437_vm5 = vcmask 654336  }
  0x18   : > { %1822 = vmatprep.subr.bf16.mxu1 %v2042_v1  ;;  %1816 = vmatprep.mubr.msk.bf16.mxu0 %vm2043_vm0, %v2042_v1  ;;  %s384_s12 = scalar_lea.vmem %s2697_s0, %s1771_s25  ;;  %v1741_v10 = vld [vmem:[%s2684_s4] ss:$0 sm:$0xff]  ;;  %v2246_v34 = vld [vmem:[%s2689_s9 + $0x58] sm:$0xff]  ;;  %v2251_v35 = vld [vmem:[%s2689_s9 + $0x50] sm:$0xff]  ;;  %s2044_s25 = smov 96   ;;  %vm1440_vm6 = vcmask 785408  }
  0x19   : > { %1813 = vmatpush3.bf16.msra.mxu0 %v1958_v3  ;;  %v386_v5 = vld [vmem:[%s384_s12] sm:$0xff]  ;;  %v387_v6 = vld [vmem:[%s384_s12 + $0x8] sm:$0xff]  ;;  %v2276_v46 = vld [vmem:[%s2689_s9 + $0x38] sm:$0xff]  ;;  %s2047_s12 = smov 64   ;;  %vm1443_vm7 = vcmask 916480  }
  0x1a   : > { %1814 = vmatprep.subr.bf16.mxu0 %v2042_v1  ;;  %v2190_v7 = vpack.c.bf16 %v387_v6, %v386_v5  ;;  %v2236_v29 = vld [vmem:[%s2689_s9 + $0x60] sm:$0xff]  ;;  %v2261_v40 = vld [vmem:[%s2689_s9 + $0x48] sm:$0xff]  ;;  %v2281_v47 = vld [vmem:[%s2689_s9 + $0x30] sm:$0xff] }
  0x1b   : > { %1823 = vmatpush3.bf16.msra.mxu1 %v1957_v2  ;;  %v2266_v41 = vld [vmem:[%s2689_s9 + $0x40] sm:$0xff]  ;;  %v2291_v52 = vld [vmem:[%s2689_s9 + $0x28] sm:$0xff]  ;;  %v2306_v58 = vld [vmem:[%s2689_s9 + $0x18] sm:$0xff] }
  0x1c   : > { %1836 = vmatprep.subr.bf16.mxu1 %v2042_v1  ;;  %v2296_v53 = vld [vmem:[%s2689_s9 + $0x20] sm:$0xff]  ;;  %v2311_v59 = vld [vmem:[%s2689_s9 + $0x10] sm:$0xff]  ;;  %v2321_v0 = vld [vmem:[%s2689_s9 + $0x8] sm:$0xff] }
  0x1d   : > { %1815 = vmatpush3.bf16.msra.mxu0 %v1959_v4  ;;  %v2326_v2 = vld [vmem:[%s2689_s9] sm:$0xff] }
  0x1e   : > { %1828 = vmatprep.subr.bf16.mxu0 %v2042_v1  ;;  %1825 = vmatmul.mubr.msk.bf16.vlgmr.msra.gmra.mxu1 %vm412_vm1, %v2190_v7 }
  0x1f   : > { %1852 = vmatprep.mubr.msk.bf16.mxu1 %vm2043_vm0, %v2042_v1 }
  0x20   : > { %1817 = vmatmul.mubr.msk.bf16.vlgmr.msra.gmra.mxu0 %vm412_vm1, %v2190_v7 }
  0x21   : > { %1832 = vmatprep.mubr.msk.bf16.mxu0 %vm2043_vm0, %v2042_v1 }
  0xde   : > { %v514_v9 = vpop.f32.mrf.mxu1 }
  0xdf   : > { %v2207_v13 = vadd.f32 %v1745_v8, %v514_v9 }
  0xe0   : > { %v450_v11 = vpop.f32.mrf.mxu0  ;;  %v1826_v12 = vpop.f32.mrf.mxu1 }
  0xe1   : > { %v2219_v18 = vadd.f32 %v1741_v10, %v450_v11  ;;  %v632_v23 = vmul.f32 %v2212_v16, %v2207_v13  ;;  %v630_v32 = vmul.f32 %v2236_v29, %v2207_v13  ;;  %v628_v38 = vmul.f32 %v2251_v35, %v2207_v13 }
  0xe2   : > { %v1818_v14 = vpop.f32.mrf.mxu0  ;;  %v517_v15 = vpop.f32.mrf.mxu1  ;;  %v626_v44 = vmul.f32 %v2266_v41, %v2207_v13  ;;  %v624_v50 = vmul.f32 %v2281_v47, %v2207_v13  ;;  %v622_v56 = vmul.f32 %v2296_v53, %v2207_v13  ;;  %v620_v62 = vmul.f32 %v2311_v59, %v2207_v13 }
  0xe3   : > { %v518_v19 = vadd.f32 %v1745_v8, %v517_v15  ;;  %v618_v5 = vmul.f32 %v2326_v2, %v2207_v13 }
  0xe4   : > { %v453_v20 = vpop.f32.mrf.mxu0  ;;  %v1827_v21 = vpop.f32.mrf.mxu1 }
  0xe5   : > { %v2221_v22 = vadd.f32 %v1741_v10, %v453_v20  ;;  %v633_v24 = vmul.f32 %v2217_v17, %v518_v19  ;;  %v631_v31 = vmul.f32 %v2229_v26, %v518_v19  ;;  %v629_v37 = vmul.f32 %v2246_v34, %v518_v19 }
  0xe6   : > { %v1819_v25 = vpop.f32.mrf.mxu0  ;;  %v627_v43 = vmul.f32 %v2261_v40, %v518_v19  ;;  %v625_v49 = vmul.f32 %v2276_v46, %v518_v19  ;;  %v623_v55 = vmul.f32 %v2291_v52, %v518_v19  ;;  %v621_v61 = vmul.f32 %v2306_v58, %v518_v19 }
  0xe7   : > { %v617_v27 = vpack.c.bf16 %v2221_v22, %v2219_v18  ;;  %v641_v28 = vpack.c.bf16 %v633_v24, %v632_v23  ;;  %v640_v33 = vpack.c.bf16 %v631_v31, %v630_v32  ;;  %v639_v39 = vpack.c.bf16 %v629_v37, %v628_v38 }
  0xe8   : > { %v638_v45 = vpack.c.bf16 %v627_v43, %v626_v44  ;;  %v637_v51 = vpack.c.bf16 %v625_v49, %v624_v50  ;;  %v636_v57 = vpack.c.bf16 %v623_v55, %v622_v56  ;;  %v635_v63 = vpack.c.bf16 %v621_v61, %v620_v62 }
  0xe9   : > { %v691_v30 = vsel %vm412_vm1, %v641_v28, 0  ;;  %v688_v36 = vsel %vm412_vm1, %v640_v33, 0  ;;  %v685_v42 = vsel %vm412_vm1, %v639_v39, 0  ;;  %v619_v4 = vmul.f32 %v2321_v0, %v518_v19 }
  0xea   : > { %1837 = vmatpush3.bf16.xpose.msra.mxu1 %v691_v30  ;;  %v682_v48 = vsel %vm412_vm1, %v638_v45, 0  ;;  %v679_v54 = vsel %vm412_vm1, %v637_v51, 0  ;;  %v676_v60 = vsel %vm412_vm1, %v636_v57, 0  ;;  %v673_v3 = vsel %vm412_vm1, %v635_v63, 0 }
  0xeb   : > { %1838 = vmatprep.subr.bf16.mxu1 %v2042_v1  ;;  %v634_v6 = vpack.c.bf16 %v619_v4, %v618_v5  ;;  %v2051_v23 = vmov 1983009808   ;;  %v783_v25 = vlaneseq  ;;  %v2052_v37 = vmov 1934713408  }
  0xec   : > { %v781_v24 = vunpack.c.l.s4 %v2051_v23  ;;  %v845_v38 = vunpack.c.l.s4 %v2052_v37 }
  0xed   : > { %v670_v8 = vsel %vm412_vm1, %v634_v6, 0  ;;  %v784_v31 = vshrl.u32 %v783_v25, 7 }
  0xee   : > { %v782_v30 = vunpack.c.0.s8 %v781_v24 }
  0xf2   : > { %1839 = vmatpush3.bf16.xpose.msra.mxu1 %v688_v36 }
  0xf3   : > { %1840 = vmatprep.subr.bf16.mxu1 %v2042_v1 }
  0xfa   : > { %1841 = vmatpush3.bf16.xpose.msra.mxu1 %v685_v42  ;;  %v2382_v42 = vsub.s32 %v782_v30, %v784_v31 }
  0xfb   : > { %1842 = vmatprep.subr.bf16.mxu1 %v2042_v1 }
 0x102   : > { %1843 = vmatpush3.bf16.xpose.msra.mxu1 %v682_v48 }
 0x103   : > { %1844 = vmatprep.subr.bf16.mxu1 %v2042_v1 }
 0x10a   : > { %1845 = vmatpush3.bf16.xpose.msra.mxu1 %v679_v54  ;;  %v846_v54 = vunpack.c.0.s8 %v845_v38 }
 0x10b   : > { %1846 = vmatprep.subr.bf16.mxu1 %v2042_v1 }
 0x112   : > { %1847 = vmatpush3.bf16.xpose.msra.mxu1 %v676_v60 }
 0x113   : > { %1848 = vmatprep.subr.bf16.mxu1 %v2042_v1 }
 0x11a   : > { %1849 = vmatpush3.bf16.xpose.msra.mxu1 %v673_v3 }
 0x11b   : > { %1850 = vmatprep.subr.bf16.mxu1 %v2042_v1 }
 0x122   : > { %1851 = vmatpush3.bf16.xpose.msra.mxu1 %v670_v8  ;;  %v2395_v8 = vsub.s32 %v846_v54, %v784_v31 }
 0x123   : > { %1896 = vmatprep.subr.bf16.mxu1 %v2042_v1 }
 0x129   : > { %1853 = vmatmul.mubr.msk.bf16.vlgmr.msra.gmra.mxu1 %vm412_vm1, %v617_v27 }
 0x12a   : > { %1900 = vmatprep.mubr.msk.bf16.mxu1 %vm2043_vm0, %v2042_v1 }
 0x1e9   : > { %v2338_v9 = vpop.f32.mrf.mxu1 }
 0x1ea   : > { %742 = vrot.lane.b32.xlu1 %v2338_v9, %s2044_s25  ;;  %736 = vrot.lane.b32.xlu0 %v2338_v9, %s2692_s29 }
 0x1eb   : > { %v1854_v10 = vpop.f32.mrf.mxu1 }
 0x1ed   : > { %v2344_v11 = vpop.f32.mrf.mxu1 }
 0x1ee   : > { %748 = vrot.lane.b32.xlu0 %v2338_v9, %s2046_s30  ;;  %744 = vrot.lane.b32.xlu1 %v2344_v11, %s2044_s25 }
 0x1ef   : > { %v1855_v12 = vpop.f32.mrf.mxu1 }
 0x1f2   : > { %754 = vrot.lane.b32.xlu0 %v2338_v9, %s2047_s12  ;;  %750 = vrot.lane.b32.xlu1 %v2344_v11, %s2046_s30 }
 0x1f6   : > { %760 = vrot.lane.b32.xlu0 %v2338_v9, %s2048_s13  ;;  %756 = vrot.lane.b32.xlu1 %v2344_v11, %s2047_s12 }
 0x1fa   : > { %766 = vrot.lane.b32.xlu0 %v2338_v9, %s2049_s14  ;;  %762 = vrot.lane.b32.xlu1 %v2344_v11, %s2048_s13 }
 0x1fe   : > { %768 = vrot.lane.b32.xlu1 %v2344_v11, %s2049_s14  ;;  %738 = vrot.lane.b32.xlu0 %v2344_v11, %s2692_s29  ;;  %s2698_s29 = smov 112  }
 0x202   : > { %774 = vrot.lane.b32.xlu1 %v2344_v11, %s2050_s15  ;;  %772 = vrot.lane.b32.xlu0 %v2338_v9, %s2050_s15 }
 0x25c   : > { %v743_v13 = vpop.permute.xlu1 %742  ;;  %v737_v14 = vpop.permute.xlu0 %736 }
 0x25d   : > { %v778_v43 = vcombine.low %v2338_v9, %v743_v13  ;;  %v779_v44 = vcombine.high %v2338_v9, %v743_v13 }
 0x25f   : > { %v786_v60 = vrot.slane %v778_v43, %v2382_v42  ;;  %v793_v61 = vrot.slane %v779_v44, %v2382_v42 }
 0x260   : > { %v749_v15 = vpop.permute.xlu0 %748  ;;  %v2370_v18 = vpop.permute.xlu1 %744 }
 0x261   : > { %v794_v36 = vcombine.low %v737_v14, %v749_v15  ;;  %v795_v39 = vcombine.high %v737_v14, %v749_v15  ;;  %v914_v23 = vcombine.low %v2344_v11, %v2370_v18 }
 0x263   : > { %v802_v48 = vrot.slane %v794_v36, %v2382_v42  ;;  %v809_v55 = vrot.slane %v795_v39, %v2382_v42 }
 0x264   : > { %v755_v19 = vpop.permute.xlu0 %754  ;;  %v2372_v20 = vpop.permute.xlu1 %750 }
 0x265   : > { %v842_v4 = vcombine.low %v786_v60, %v802_v48  ;;  %v843_v10 = vcombine.high %v786_v60, %v802_v48  ;;  %v858_v12 = vcombine.low %v793_v61, %v809_v55  ;;  %v859_v37 = vcombine.high %v793_v61, %v809_v55 }
 0x267   : > { %v866_v39 = vrot.slane %v858_v12, %v2395_v8  ;;  %v857_v48 = vrot.slane %v843_v10, %v2395_v8 }
 0x268   : > { %v761_v21 = vpop.permute.xlu0 %760  ;;  %v2374_v22 = vpop.permute.xlu1 %756 }
 0x26c   : > { %v767_v27 = vpop.permute.xlu0 %766  ;;  %v2376_v28 = vpop.permute.xlu1 %762 }
 0x26d   : > { %v810_v49 = vcombine.low %v755_v19, %v767_v27  ;;  %v811_v50 = vcombine.high %v755_v19, %v767_v27  ;;  %v850_v27 = vrot.slane %v842_v4, %v2395_v8 }
 0x26f   : > { %v818_v5 = vrot.slane %v810_v49, %v2382_v42  ;;  %v825_v6 = vrot.slane %v811_v50, %v2382_v42  ;;  %v922_v49 = vrot.slane %v914_v23, %v2382_v42 }
 0x270   : > { %v2378_v32 = vpop.permute.xlu1 %768  ;;  %v2380_v33 = vpop.permute.xlu0 %738 }
 0x271   : > { %v946_v13 = vcombine.low %v2374_v22, %v2378_v32  ;;  %v930_v14 = vcombine.low %v2380_v33, %v2372_v20 }
 0x273   : > { %v954_v38 = vrot.slane %v946_v13, %v2382_v42  ;;  %v938_v43 = vrot.slane %v930_v14, %v2382_v42 }
 0x274   : > { %v773_v45 = vpop.permute.xlu0 %772  ;;  %v775_v51 = vpop.permute.xlu1 %774 }
 0x275   : > { %v826_v56 = vcombine.low %v761_v21, %v773_v45  ;;  %v827_v57 = vcombine.high %v761_v21, %v773_v45  ;;  %v962_v62 = vcombine.low %v2376_v28, %v775_v51  ;;  %v963_v50 = vcombine.high %v2376_v28, %v775_v51 }
 0x276   : > { %v873_v28 = vrot.slane %v859_v37, %v2395_v8  ;;  %v915_v51 = vcombine.high %v2344_v11, %v2370_v18 }
 0x277   : > { %v834_v63 = vrot.slane %v826_v56, %v2382_v42  ;;  %v841_v3 = vrot.slane %v827_v57, %v2382_v42  ;;  %v970_v24 = vrot.slane %v962_v62, %v2382_v42  ;;  %v947_v62 = vcombine.high %v2374_v22, %v2378_v32 }
 0x278   : > { %v977_v4 = vrot.slane %v963_v50, %v2382_v42  ;;  %v929_v14 = vrot.slane %v915_v51, %v2382_v42 }
 0x279   : > { %v874_v15 = vcombine.low %v818_v5, %v834_v63  ;;  %v875_v19 = vcombine.high %v818_v5, %v834_v63  ;;  %v890_v21 = vcombine.low %v825_v6, %v841_v3  ;;  %v891_v25 = vcombine.high %v825_v6, %v841_v3 }
 0x27a   : > { %v1010_v54 = vcombine.low %v954_v38, %v970_v24  ;;  %v931_v63 = vcombine.high %v2380_v33, %v2372_v20  ;;  %v978_v3 = vcombine.low %v922_v49, %v938_v43  ;;  %v1011_v5 = vcombine.high %v954_v38, %v970_v24 }
 0x27b   : > { %v882_v30 = vrot.slane %v874_v15, %v2395_v8  ;;  %v898_v31 = vrot.slane %v890_v21, %v2395_v8  ;;  %v889_v36 = vrot.slane %v875_v19, %v2395_v8  ;;  %v905_v56 = vrot.slane %v891_v25, %v2395_v8 }
 0x27c   : > { %v1018_v6 = vrot.slane %v1010_v54, %v2395_v8  ;;  %v961_v13 = vrot.slane %v947_v62, %v2382_v42  ;;  %v945_v20 = vrot.slane %v931_v63, %v2382_v42  ;;  %v979_v33 = vcombine.high %v922_v49, %v938_v43 }
 0x27d   : > { %v907_v44 = vcombine.high %v850_v27, %v882_v30  ;;  %v906_v45 = vcombine.low %v850_v27, %v882_v30  ;;  %v910_v60 = vcombine.low %v866_v39, %v898_v31  ;;  %v908_v61 = vcombine.low %v857_v48, %v889_v36 }
 0x27e   : > { %v912_v32 = vcombine.low %v873_v28, %v905_v56  ;;  %v909_v12 = vcombine.high %v857_v48, %v889_v36  ;;  %v986_v18 = vrot.slane %v978_v3, %v2395_v8  ;;  %v1026_v15 = vcombine.low %v961_v13, %v977_v4 }
 0x27f   : > { %v1054_v55 = vsel %vm1050_vm2, %v907_v44, -inf  ;;  %v1051_v57 = vsel %vm1050_vm2, %v906_v45, -inf  ;;  %v1063_v10 = vsel %vm1050_vm2, %v910_v60, -inf  ;;  %v1057_v22 = vsel %vm1050_vm2, %v908_v61, -inf }
 0x280   : > { %1055 = vmax.xlane.f32.xlu1 %v1054_v55  ;;  %1052 = vmax.xlane.f32.xlu0 %v1051_v57  ;;  %v1025_v19 = vrot.slane %v1011_v5, %v2395_v8  ;;  %v1069_v21 = vsel %vm1050_vm2, %v912_v32, -inf  ;;  %v1060_v23 = vsel %vm1050_vm2, %v909_v12, -inf  ;;  %v1042_v24 = vcombine.low %v986_v18, %v1018_v6 }
 0x281   : > { %v911_v25 = vcombine.high %v866_v39, %v898_v31  ;;  %v994_v27 = vcombine.low %v929_v14, %v945_v20  ;;  %v993_v30 = vrot.slane %v979_v33, %v2395_v8  ;;  %v1027_v36 = vcombine.high %v961_v13, %v977_v4 }
 0x282   : > { %v1034_v37 = vrot.slane %v1026_v15, %v2395_v8  ;;  %v1075_v38 = vsel %vm1050_vm2, %v1042_v24, -inf  ;;  %v913_v45 = vcombine.high %v873_v28, %v905_v56  ;;  %v995_v48 = vcombine.high %v929_v14, %v945_v20 }
 0x283   : > { %v1066_v43 = vsel %vm1050_vm2, %v911_v25, -inf  ;;  %v1044_v44 = vcombine.low %v993_v30, %v1025_v19  ;;  %v1002_v49 = vrot.slane %v994_v27, %v2395_v8  ;;  %v1041_v31 = vrot.slane %v1027_v36, %v2395_v8 }
 0x284   : > { %1064 = vmax.xlane.f32.xlu1 %v1063_v10  ;;  %1058 = vmax.xlane.f32.xlu0 %v1057_v22  ;;  %v1072_v50 = vsel %vm1050_vm2, %v913_v45, -inf  ;;  %v1043_v55 = vcombine.high %v986_v18, %v1018_v6  ;;  %v1009_v57 = vrot.slane %v995_v48, %v2395_v8  ;;  %v1045_v62 = vcombine.high %v993_v30, %v1025_v19  ;;  %v1960_v6 = vld [vmem:[%s2683_s3 + $0x8] sm:$0xff]   ;;  %v1961_v10 = vld [vmem:[%s2683_s3] sm:$0xff]  }
 0x285   : > { %v1081_v39 = vsel %vm1050_vm2, %v1044_v44, -inf  ;;  %v1046_v54 = vcombine.low %v1002_v49, %v1034_v37  ;;  %v1047_v28 = vcombine.high %v1002_v49, %v1034_v37  ;;  %1829 = vmatpush3.bf16.msra.mxu0 %v1960_v6 }
 0x286   : > { %v1078_v56 = vsel %vm1050_vm2, %v1043_v55, -inf  ;;  %v1048_v61 = vcombine.low %v1009_v57, %v1041_v31  ;;  %v1084_v3 = vsel %vm1050_vm2, %v1045_v62, -inf  ;;  %v1049_v4 = vcombine.high %v1009_v57, %v1041_v31  ;;  %1830 = vmatprep.subr.bf16.mxu0 %v2042_v1 }
 0x287   : > { %v1087_v60 = vsel %vm1050_vm2, %v1046_v54, -inf  ;;  %v1090_v51 = vsel %vm1050_vm2, %v1047_v28, -inf }
 0x288   : > { %1070 = vmax.xlane.f32.xlu1 %v1069_v21  ;;  %1061 = vmax.xlane.f32.xlu0 %v1060_v23  ;;  %v1093_v63 = vsel %vm1050_vm2, %v1048_v61, -inf  ;;  %v1096_v5 = vsel %vm1050_vm2, %v1049_v4, -inf }
 0x289   : > { %1831 = vmatpush3.bf16.msra.mxu0 %v1961_v10 }
 0x28a   : > { %1856 = vmatprep.subr.bf16.mxu0 %v2042_v1 }
 0x28c   : > { %1076 = vmax.xlane.f32.xlu1 %v1075_v38  ;;  %1067 = vmax.xlane.f32.xlu0 %v1066_v43 }
 0x28d   : > { %1833 = vmatmul.mubr.msk.bf16.vlgmr.msra.gmra.mxu0 %vm412_vm1, %v2190_v7 }
 0x28e   : > { %1872 = vmatprep.mubr.msk.bf16.mxu0 %vm2043_vm0, %v2042_v1 }
 0x290   : > { %1082 = vmax.xlane.f32.xlu1 %v1081_v39  ;;  %1073 = vmax.xlane.f32.xlu0 %v1072_v50 }
 0x294   : > { %1088 = vmax.xlane.f32.xlu1 %v1087_v60  ;;  %1079 = vmax.xlane.f32.xlu0 %v1078_v56 }
 0x298   : > { %1094 = vmax.xlane.f32.xlu1 %v1093_v63  ;;  %1085 = vmax.xlane.f32.xlu0 %v1084_v3 }
 0x29c   : > { %1091 = vmax.xlane.f32.xlu0 %v1090_v51 }
 0x2a0   : > { %1097 = vmax.xlane.f32.xlu0 %v1096_v5 }
 0x309   : > { %v1056_v22 = vpop.xlane.xlu1 %1055  ;;  %v1053_v32 = vpop.xlane.xlu0 %1052 }
 0x30d   : > { %v1065_v12 = vpop.xlane.xlu1 %1064  ;;  %v1059_v13 = vpop.xlane.xlu0 %1058 }
 0x30e   : > { %v1099_v19 = vcombine.low %v1053_v32, %v1059_v13  ;;  %v1100_v37 = vcombine.high %v1053_v32, %v1059_v13 }
 0x310   : > { %v1107_v38 = vrot.slane %v1099_v19, %v2382_v42  ;;  %v1114_v57 = vrot.slane %v1100_v37, %v2382_v42 }
 0x311   : > { %v1071_v20 = vpop.xlane.xlu1 %1070  ;;  %v1062_v33 = vpop.xlane.xlu0 %1061 }
 0x312   : > { %v1115_v18 = vcombine.low %v1056_v22, %v1062_v33  ;;  %v1131_v21 = vcombine.low %v1065_v12, %v1071_v20  ;;  %v1132_v23 = vcombine.high %v1065_v12, %v1071_v20  ;;  %v1116_v24 = vcombine.high %v1056_v22, %v1062_v33 }
 0x314   : > { %v1123_v25 = vrot.slane %v1115_v18, %v2382_v42  ;;  %v1139_v43 = vrot.slane %v1131_v21, %v2382_v42  ;;  %v1146_v48 = vrot.slane %v1132_v23, %v2382_v42  ;;  %v2475_v49 = vrot.slane %v1116_v24, %v2382_v42 }
 0x315   : > { %v2462_v14 = vpop.xlane.xlu1 %1076  ;;  %v1068_v15 = vpop.xlane.xlu0 %1067 }
 0x316   : > { %v1163_v31 = vcombine.low %v1107_v38, %v1123_v25  ;;  %v1164_v39 = vcombine.high %v1107_v38, %v1123_v25  ;;  %v1179_v63 = vcombine.low %v1114_v57, %v2475_v49 }
 0x318   : > { %v1178_v28 = vrot.slane %v1164_v39, %v2395_v8  ;;  %v2486_v51 = vrot.slane %v1163_v31, %v2395_v8  ;;  %v1187_v12 = vrot.slane %v1179_v63, %v2395_v8 }
 0x319   : > { %v2465_v7 = vpop.xlane.xlu1 %1082  ;;  %v1074_v27 = vpop.xlane.xlu0 %1073 }
 0x31a   : > { %v1147_v30 = vcombine.low %v1068_v15, %v1074_v27  ;;  %v1148_v36 = vcombine.high %v1068_v15, %v1074_v27  ;;  %v1235_v13 = vcombine.low %v2462_v14, %v2465_v7  ;;  %v1236_v31 = vcombine.high %v2462_v14, %v2465_v7 }
 0x31c   : > { %v1155_v44 = vrot.slane %v1147_v30, %v2382_v42  ;;  %v2471_v45 = vrot.slane %v1148_v36, %v2382_v42  ;;  %v1243_v23 = vrot.slane %v1235_v13, %v2382_v42 }
 0x31d   : > { %v1080_v50 = vpop.xlane.xlu0 %1079  ;;  %v1089_v56 = vpop.xlane.xlu1 %1088 }
 0x31e   : > { %v1195_v54 = vcombine.low %v1139_v43, %v1155_v44  ;;  %v1196_v55 = vcombine.high %v1139_v43, %v1155_v44  ;;  %v1211_v60 = vcombine.low %v1146_v48, %v2471_v45  ;;  %v1212_v39 = vcombine.high %v1146_v48, %v2471_v45 }
 0x31f   : > { %v1250_v45 = vrot.slane %v1236_v31, %v2382_v42 }
 0x320   : > { %v1210_v61 = vrot.slane %v1196_v55, %v2395_v8  ;;  %v2481_v62 = vrot.slane %v1195_v54, %v2395_v8  ;;  %v1219_v6 = vrot.slane %v1211_v60, %v2395_v8 }
 0x321   : > { %v1086_v3 = vpop.xlane.xlu0 %1085  ;;  %v1095_v22 = vpop.xlane.xlu1 %1094 }
 0x322   : > { %v1230_v4 = vcombine.high %v1178_v28, %v1210_v61  ;;  %v1228_v5 = vcombine.high %v2486_v51, %v2481_v62  ;;  %v1251_v10 = vcombine.low %v1080_v50, %v1086_v3  ;;  %v1231_v20 = vcombine.low %v1187_v12, %v1219_v6 }
 0x323   : > { %v1229_v33 = vcombine.low %v1178_v28, %v1210_v61  ;;  %v1227_v18 = vcombine.low %v2486_v51, %v2481_v62  ;;  %v1267_v15 = vcombine.low %v1089_v56, %v1095_v22  ;;  %v1268_v27 = vcombine.high %v1089_v56, %v1095_v22 }
 0x324   : > { %1389 = vrot.lane.b32.xlu0 %v1230_v4, %s2048_s13  ;;  %1373 = vrot.lane.b32.xlu1 %v1228_v5, %s2050_s15  ;;  %v1259_v19 = vrot.slane %v1251_v10, %v2382_v42  ;;  %v1252_v30 = vcombine.high %v1080_v50, %v1086_v3  ;;  %v1232_v36 = vcombine.high %v1187_v12, %v1219_v6  ;;  %v1963_v12 = vld [vmem:[%s2690_s10 + $0x30] sm:$0xff]  }
 0x325   : > { %v1092_v32 = vpop.xlane.xlu0 %1091  ;;  %v1275_v37 = vrot.slane %v1267_v15, %v2382_v42  ;;  %v1180_v50 = vcombine.high %v1114_v57, %v2475_v49  ;;  %v1282_v56 = vrot.slane %v1268_v27, %v2382_v42  ;;  %v1226_v57 = vrot.slane %v1212_v39, %v2395_v8  ;;  %v1965_v27 = vld [vmem:[%s2690_s10 + $0x20] sm:$0xff]  }
 0x326   : > { %v1299_v38 = vcombine.low %v1243_v23, %v1259_v19  ;;  %v1300_v43 = vcombine.high %v1243_v23, %v1259_v19  ;;  %v1266_v61 = vrot.slane %v1252_v30, %v2382_v42  ;;  %v1964_v19 = vld [vmem:[%s2690_s10 + $0x28] sm:$0xff]  }
 0x327   : > { %v1194_v6 = vrot.slane %v1180_v50, %v2395_v8 }
 0x328   : > { %1397 = vrot.lane.b32.xlu0 %v1231_v20, %s2047_s12  ;;  %1381 = vrot.lane.b32.xlu1 %v1229_v33, %s2049_s14  ;;  %v1314_v63 = vrot.slane %v1300_v43, %v2395_v8  ;;  %v2515_v14 = vrot.slane %v1299_v38, %v2395_v8  ;;  %v1315_v5 = vcombine.low %v1250_v45, %v1266_v61  ;;  %v1968_v38 = vld [vmem:[%s2690_s10 + $0x8] sm:$0xff]   ;;  %v1969_v43 = vld [vmem:[%s2690_s10] sm:$0xff]  }
 0x329   : > { %v1098_v21 = vpop.xlane.xlu0 %1097  ;;  %v1233_v22 = vcombine.low %v1194_v6, %v1226_v57  ;;  %v1234_v15 = vcombine.high %v1194_v6, %v1226_v57 }
 0x32a   : > { %v1283_v24 = vcombine.low %v1092_v32, %v1098_v21  ;;  %v1284_v25 = vcombine.high %v1092_v32, %v1098_v21  ;;  %v1323_v13 = vrot.slane %v1315_v5, %v2395_v8  ;;  %v1316_v21 = vcombine.high %v1250_v45, %v1266_v61 }
 0x32c   : > { %v1291_v44 = vrot.slane %v1283_v24, %v2382_v42  ;;  %1405 = vrot.lane.b32.xlu0 %v1232_v36, %s2046_s30  ;;  %v1298_v54 = vrot.slane %v1284_v25, %v2382_v42  ;;  %v1962_v42 = vld [vmem:[%s2690_s10 + $0x38] sm:$0xff]   ;;  %v1330_v25 = vrot.slane %v1316_v21, %v2395_v8 }
 0x32d   : > { %1857 = vmatpush3.bf16.msra.mxu0 %v1962_v42  ;;  %v1966_v36 = vld [vmem:[%s2690_s10 + $0x18] sm:$0xff]  }
 0x32e   : > { %v1331_v55 = vcombine.low %v1275_v37, %v1291_v44  ;;  %v1332_v60 = vcombine.high %v1275_v37, %v1291_v44  ;;  %v1347_v48 = vcombine.low %v1282_v56, %v1298_v54  ;;  %1858 = vmatprep.subr.bf16.mxu0 %v2042_v1  ;;  %v1348_v20 = vcombine.high %v1282_v56, %v1298_v54 }
 0x330   : > { %v1346_v3 = vrot.slane %v1332_v60, %v2395_v8  ;;  %v2518_v7 = vrot.slane %v1331_v55, %v2395_v8  ;;  %v1355_v32 = vrot.slane %v1347_v48, %v2395_v8  ;;  %v1362_v24 = vrot.slane %v1348_v20, %v2395_v8  ;;  %v1967_v8 = vld [vmem:[%s2690_s10 + $0x10] sm:$0xff]  }
 0x331   : > { %1859 = vmatpush3.bf16.msra.mxu0 %v1963_v12 }
 0x332   : > { %v1365_v28 = vcombine.low %v1314_v63, %v1346_v3  ;;  %v1364_v49 = vcombine.high %v2515_v14, %v2518_v7  ;;  %v1363_v4 = vcombine.low %v2515_v14, %v2518_v7  ;;  %v1366_v10 = vcombine.high %v1314_v63, %v1346_v3  ;;  %1860 = vmatprep.subr.bf16.mxu0 %v2042_v1 }
 0x333   : > { %v1367_v33 = vcombine.low %v1323_v13, %v1355_v32  ;;  %v1368_v23 = vcombine.high %v1323_v13, %v1355_v32  ;;  %v1369_v30 = vcombine.low %v1330_v25, %v1362_v24  ;;  %v1370_v37 = vcombine.high %v1330_v25, %v1362_v24  ;;  %v1749_v24 = vld [vmem:[%s2686_s6] ss:$0 sm:$0xff] }
 0x334   : > { %1383 = vrot.lane.b32.xlu1 %v1365_v28, %s2049_s14  ;;  %1375 = vrot.lane.b32.xlu0 %v1364_v49, %s2050_s15  ;;  %s377_s14 = sand.u32 1, %s2032_s18  }
 0x335   : > { %1861 = vmatpush3.bf16.msra.mxu0 %v1964_v19  ;;  %s1738_s15 = sshll.u32 %s377_s14, 4 }
 0x336   : > { %1862 = vmatprep.subr.bf16.mxu0 %v2042_v1 }
 0x338   : > { %1391 = vrot.lane.b32.xlu1 %v1366_v10, %s2048_s13  ;;  %1413 = vrot.lane.b32.xlu0 %v1233_v22, %s2044_s25  ;;  %s2053_s13 = smov [#allocation2]  }
 0x339   : > { %1863 = vmatpush3.bf16.msra.mxu0 %v1965_v27 }
 0x33a   : > { %1864 = vmatprep.subr.bf16.mxu0 %v2042_v1 }
 0x33c   : > { %1399 = vrot.lane.b32.xlu1 %v1367_v33, %s2047_s12  ;;  %1421 = vrot.lane.b32.xlu0 %v1234_v15, %s2698_s29 }
 0x33d   : > { %1865 = vmatpush3.bf16.msra.mxu0 %v1966_v36 }
 0x33e   : > { %1866 = vmatprep.subr.bf16.mxu0 %v2042_v1 }
 0x340   : > { %1407 = vrot.lane.b32.xlu1 %v1368_v23, %s2046_s30  ;;  %s2637_s30 = scalar_lea.hbm %s2691_s11, %s1772_s22 }
 0x341   : > { %1867 = vmatpush3.bf16.msra.mxu0 %v1967_v8 }
 0x342   : > { %1868 = vmatprep.subr.bf16.mxu0 %v2042_v1 }
 0x344   : > { %1415 = vrot.lane.b32.xlu1 %v1369_v30, %s2044_s25  ;;  %s1984_s25 = sshll.u32 %s2053_s13, 4  ;;  %s1985_s25 = int_to_ptr.vmem [resolvable:$false] %s1984_s25 }
 0x345   : > { %1869 = vmatpush3.bf16.msra.mxu0 %v1968_v38  ;;  %s1986_s0 = scalar_lea.vmem %s1985_s25, 512 }
 0x346   : > { %1870 = vmatprep.subr.bf16.mxu0 %v2042_v1 }
 0x348   : > { %1423 = vrot.lane.b32.xlu1 %v1370_v37, %s2698_s29  ;;  %s379_s29 = scalar_lea.vmem [#allocation2], %s1738_s15  ;;  %s2640_s15 = scalar_lea.sflag [#allocation3], %s377_s14 }
 0x349   : > { %1871 = vmatpush3.bf16.msra.mxu0 %v1969_v43  ;;  %s1672_s16 = sshll.u32 %s379_s29, 4  ;;  %s2632_s16 = int_to_ptr.vmem [resolvable:$true] %s1672_s16 }
 0x34a   : > { %1876 = vmatprep.subr.bf16.mxu0 %v2042_v1  ;;  %s1980_s21 = scalar_lea.vmem %s2632_s16, 256  ;;  %p1987_p0 = scmp.lt.s32.totalorder %s2632_s16, %s1985_s25 }
 0x34b   : > { %p1981_p11 = scmp.ne.s32.totalorder %s2632_s16, %s1980_s21  ;;  %p1988_p1 = scmp.lt.s32.totalorder %s1986_s0, %s1980_s21 }
 0x34d   : > { %v578_v44 = vpop.f32.mrf.mxu0  ;;  %p1982_p12 = pnand %p1981_p11, %p2154_p5  ;;  %p1989_p2 = por %p1988_p1, %p1987_p0 }
 0x34e   : > { %v579_v25 = vadd.f32 %v1749_v24, %v578_v44 }
 0x34f   : > { %v1834_v31 = vpop.f32.mrf.mxu0  ;;  %p1983_p13 = pneg %p1982_p12 }
 0x350   : > { %v654_v38 = vmul.f32 %v2236_v29, %v579_v25 }
 0x351   : > { %v581_v39 = vpop.f32.mrf.mxu0  ;;  %p1990_p3 = pnand %p1989_p2, %p1983_p13 }
 0x352   : > { %v582_v27 = vadd.f32 %v1749_v24, %v581_v39  ;;  %v648_v39 = vmul.f32 %v2281_v47, %v579_v25  ;;  %v642_v47 = vmul.f32 %v2326_v2, %v579_v25 }
 0x353   : > { %v1835_v55 = vpop.f32.mrf.mxu0 }
 0x354   : > { %v657_v30 = vmul.f32 %v2217_v17, %v582_v27  ;;  %v653_v44 = vmul.f32 %v2246_v34, %v582_v27  ;;  %v650_v17 = vmul.f32 %v2266_v41, %v579_v25  ;;  %v651_v29 = vmul.f32 %v2261_v40, %v582_v27 }
 0x355   : > { %v646_v55 = vmul.f32 %v2296_v53, %v579_v25  ;;  %v644_v41 = vmul.f32 %v2311_v59, %v579_v25  ;;  %v1970_v53 = vld [vmem:[%s2687_s7 + $0x8] sm:$0xff]  }
 0x356   : > { %1897 = vmatpush3.bf16.msra.mxu1 %v1970_v53 }
 0x357   : > { %1898 = vmatprep.subr.bf16.mxu1 %v2042_v1 }
 0x396   : > { %v1390_v54 = vpop.permute.xlu0 %1389  ;;  %v1374_v60 = vpop.permute.xlu1 %1373 }
 0x397   : > { %v1427_v45 = vsel %vm1050_vm2, %v1227_v18, %v1374_v60  ;;  %v647_v60 = vmul.f32 %v2291_v52, %v582_v27 }
 0x399   : > { %v660_v40 = vpack.c.bf16 %v647_v60, %v646_v55 }
 0x39a   : > { %v1398_v50 = vpop.permute.xlu0 %1397  ;;  %v1382_v56 = vpop.permute.xlu1 %1381 }
 0x39b   : > { %v1429_v48 = vsel %vm412_vm1, %v1427_v45, %v1382_v56  ;;  %v643_v56 = vmul.f32 %v2321_v0, %v582_v27 }
 0x39c   : > { %v1432_v57 = vsel %vm1431_vm3, %v1429_v48, %v1390_v54  ;;  %v652_v54 = vmul.f32 %v2251_v35, %v579_v25  ;;  %v649_v35 = vmul.f32 %v2276_v46, %v582_v27 }
 0x39d   : > { %v1435_v6 = vsel %vm1434_vm4, %v1432_v57, %v1398_v50  ;;  %v645_v50 = vmul.f32 %v2306_v58, %v582_v27  ;;  %v658_v52 = vpack.c.bf16 %v643_v56, %v642_v47 }
 0x39e   : > { %v1406_v61 = vpop.permute.xlu0 %1405  ;;  %v661_v34 = vpack.c.bf16 %v649_v35, %v648_v39 }
 0x39f   : > { %v1438_v10 = vsel %vm1437_vm5, %v1435_v6, %v1406_v61  ;;  %v659_v46 = vpack.c.bf16 %v645_v50, %v644_v41 }
 0x3a6   : > { %v1384_v63 = vpop.permute.xlu1 %1383  ;;  %v1376_v3 = vpop.permute.xlu0 %1375 }
 0x3a7   : > { %v1428_v62 = vsel %vm1050_vm2, %v1363_v4, %v1376_v3 }
 0x3a8   : > { %v1430_v32 = vsel %vm412_vm1, %v1428_v62, %v1384_v63 }
 0x3aa   : > { %v1392_v28 = vpop.permute.xlu1 %1391  ;;  %v1414_v49 = vpop.permute.xlu0 %1413 }
 0x3ab   : > { %v1441_v51 = vsel %vm1440_vm6, %v1438_v10, %v1414_v49  ;;  %v1433_v13 = vsel %vm1431_vm3, %v1430_v32, %v1392_v28  ;;  %v1971_v28 = vld [vmem:[%s2687_s7] sm:$0xff]  }
 0x3ac   : > { %1899 = vmatpush3.bf16.msra.mxu1 %v1971_v28 }
 0x3ae   : > { %v1400_v5 = vpop.permute.xlu1 %1399  ;;  %v1422_v42 = vpop.permute.xlu0 %1421 }
 0x3af   : > { %v1444_v18 = vsel %vm1443_vm7, %v1441_v51, %v1422_v42  ;;  %v1436_v33 = vsel %vm1434_vm4, %v1433_v13, %v1400_v5  ;;  %v1762_v42 = vld [vmem:[%s2688_s8] ss:$0 sm:$0xff] }
 0x3b0   : > { %v1446_v20 = vsub.f32 %v2338_v9, %v1444_v18  ;;  %v656_v9 = vmul.f32 %v2212_v16, %v579_v25  ;;  %v663_v16 = vpack.c.bf16 %v653_v44, %v652_v54 }
 0x3b2   : > { %v1408_v22 = vpop.permute.xlu1 %1407  ;;  %v1448_v23 = vmul.f32 1.442695, %v1446_v20  ;;  %v665_v8 = vpack.c.bf16 %v657_v30, %v656_v9 }
 0x3b3   : > { %v1439_v15 = vsel %vm1437_vm5, %v1436_v33, %v1408_v22 }
 0x3b4   : > { %1972 = vpow2.f32 %v1448_v23 }
 0x3b6   : > { %v1416_v12 = vpop.permute.xlu1 %1415 }
 0x3b7   : > { %v1442_v19 = vsel %vm1440_vm6, %v1439_v15, %v1416_v12 }
 0x3ba   : > { %v1424_v21 = vpop.permute.xlu1 %1423 }
 0x3bb   : > { %v1445_v14 = vsel %vm1443_vm7, %v1442_v19, %v1424_v21 }
 0x3bc   : > { %v1447_v7 = vsub.f32 %v2344_v11, %v1445_v14  ;;  %v655_v11 = vmul.f32 %v2229_v26, %v582_v27  ;;  %v662_v26 = vpack.c.bf16 %v651_v29, %v650_v17 }
 0x3be   : > { %v1450_v4 = vmul.f32 1.442695, %v1447_v7  ;;  %v664_v31 = vpack.c.bf16 %v655_v11, %v654_v38 }
 0x3c0   : > { %1974 = vpow2.f32 %v1450_v4 }
 0x3c1   : > { %v1973_v36 = vpop.eup %1972 }
 0x3cd   : > { %v1975_v37 = vpop.eup %1974 }
 0x3ce   : > { %v1452_v43 = vpack.c.bf16 %v1975_v37, %v1973_v36 }
 0x3d0   : > { %1873 = vmatmul.mubr.bf16.vlgmr.msra.gmra.mxu0 %v1452_v43 }
 0x3d1   : > { %1877 = vmatpush3.bf16.msra.mxu0 %v665_v8  ;;  %1892 = vmatprep.mubr.msk.bf16.mxu0 %vm2043_vm0, %v2042_v1 }
 0x3d2   : > { %1878 = vmatprep.subr.bf16.mxu0 %v2042_v1 }
 0x3d5   : > { %1879 = vmatpush3.bf16.msra.mxu0 %v664_v31 }
 0x3d6   : > { %1880 = vmatprep.subr.bf16.mxu0 %v2042_v1 }
 0x3d9   : > { %1881 = vmatpush3.bf16.msra.mxu0 %v663_v16 }
 0x3da   : > { %1882 = vmatprep.subr.bf16.mxu0 %v2042_v1 }
 0x3dd   : > { %1883 = vmatpush3.bf16.msra.mxu0 %v662_v26 }
 0x3de   : > { %1884 = vmatprep.subr.bf16.mxu0 %v2042_v1 }
 0x3e1   : > { %1885 = vmatpush3.bf16.msra.mxu0 %v661_v34 }
 0x3e2   : > { %1886 = vmatprep.subr.bf16.mxu0 %v2042_v1 }
 0x3e5   : > { %1887 = vmatpush3.bf16.msra.mxu0 %v660_v40 }
 0x3e6   : > { %1888 = vmatprep.subr.bf16.mxu0 %v2042_v1 }
 0x3e9   : > { %1889 = vmatpush3.bf16.msra.mxu0 %v659_v46 }
 0x3ea   : > { %1890 = vmatprep.subr.bf16.mxu0 %v2042_v1 }
 0x3ed   : > { %1891 = vmatpush3.bf16.msra.mxu0 %v658_v52 }
 0x490   : > { %v1535_v58 = vpop.f32.mrf.mxu0 }
 0x491   : > { %1976 = vrcp.f32 %v1535_v58 }
 0x492   : > { %v1874_v59 = vpop.f32.mrf.mxu0 }
 0x494   : > { %v1538_v2 = vpop.f32.mrf.mxu0 }
 0x495   : > { %1978 = vrcp.f32 %v1538_v2 }
 0x496   : > { %v1875_v0 = vpop.f32.mrf.mxu0 }
 0x49e   : > { %v1977_v61 = vpop.eup %1976 }
 0x49f   : > { %v1544_v3 = vmul.f32 %v1977_v61, %v1973_v36 }
 0x4a2   : > { %v1979_v63 = vpop.eup %1978 }
 0x4a3   : > { %v1545_v45 = vmul.f32 %v1979_v63, %v1975_v37 }
 0x4a5   : > { %v1546_v48 = vpack.c.bf16 %v1545_v45, %v1544_v3 }
 0x4a7   : > { %1893 = vmatmul.mubr.bf16.vlgmr.msra.gmra.mxu0 %v1546_v48 }
 0x567   : > { %v1581_v1 = vpop.f32.mrf.mxu0 }
 0x569   : > { %v1894_v49 = vpop.f32.mrf.mxu0 }
 0x56b   : > { %v1584_v57 = vpop.f32.mrf.mxu0 }
 0x56c   : > { %v1588_v5 = vpack.c.bf16 %v1584_v57, %v1581_v1 }
 0x56d   : > { %v1895_v6 = vpop.f32.mrf.mxu0 }
 0x56e   : > { %1901 = vmatmul.mubr.msk.bf16.vlgmr.msra.gmra.mxu1 %vm412_vm1, %v1588_v5 }
 0x62e   : > { %v1649_v10 = vpop.f32.mrf.mxu1 }
 0x62f   : > { %v1650_v22 = vadd.f32 %v1762_v42, %v1649_v10 }
 0x630   : > { %v1902_v62 = vpop.f32.mrf.mxu1 }
 0x631   : > { %1656 = vst.msk [vmem:[%s379_s29] sm:$0xff] %vm412_vm1, %v1650_v22 }
 0x632   : > { %v1652_v51 = vpop.f32.mrf.mxu1 }
 0x633   : > { %v1653_v18 = vadd.f32 %v1762_v42, %v1652_v51 }
 0x634   : > { %v1903_v32 = vpop.f32.mrf.mxu1 }
 0x635   : > { %1657 = vst.msk [vmem:[%s379_s29 + $0x8] sm:$0xff] %vm412_vm1, %v1653_v18 }
 0x636   : > { %1993 = shalt.err (!%p1990_p3)
}
 0x637   : > { %s1994_s14 = scalar_lea.hbm %s2637_s30, 256  ;;  %s1998_s12 = scalar_lea.hbm %s2691_s11, 512 }
 0x638   : > { %p1995_p4 = scmp.ne.s32.totalorder %s2637_s30, %s1994_s14  ;;  %p1999_p9 = scmp.lt.s32.totalorder %s2637_s30, %s2691_s11 }
 0x639   : > { %p2000_p10 = scmp.lt.s32.totalorder %s1998_s12, %s1994_s14 }
 0x63a   : > { %p1996_p7 = pnand %p1995_p4, %p2154_p5 }
 0x63b   : > { %p2001_p11 = por %p2000_p10, %p1999_p9 }
 0x63c   : > { %p1997_p8 = pneg %p1996_p7 }
 0x63e   : > { %p2002_p12 = pnand %p2001_p11, %p1997_p8 }
 0x640   : > { %2005 = shalt.err (!%p2002_p12)
}
 0x641   : > { %s2054_s0 = smov 128   ;;  %s2055_s21 = smov 8  }
 0x642   : > { %1904 = dma.vmem_to_hbm [thread:$0]  (%p2154_p5), %s2632_s16, 256, %s2637_s30, %s2640_s15, %s2054_s0, %s2054_s0, %s2055_s21  }
 0x643 PF: > { %p1910_p13 = scmp.ge.s32.totalorder %s2040_s20, 2  ;;  %s1687_s25 = sand.u32 1, %s2028_s17  }
 0x644   : > { %s1688_s14 = scalar_lea.sflag [#allocation3], %s1687_s25 }
 0x645   : > { %p1907_p0 = pnand %p1910_p13, %p2158_p6 }
 0x647   : > { %p1908_p1 = pneg %p1907_p0 }
 0x649   : > { %2023 = dma.done.wait (%p1908_p1), %s1688_s14, 256  }
 0x64a   : > { %2025 = vsyncadd (%p1908_p1), %s1688_s14, 4294967040  ;;  %p21_p2 = scmp.ge.s32.totalorder %s2141_s23, 4   ;;  %s2699_s17 = smov %s2032_s18 }
 0x64b   : > { %s2700_s18 = smov %s2036_s19  ;;  %s2701_s19 = smov %s2152_s26 }
 0x64c   : > { %s2702_s20 = smov %s2141_s23  ;;  %23 = sbr.rel (!%p21_p2) target bundleno = 5 (0x5), region = 99 }
 0x651   :  { %1693 = vsyncpa [#allocation3], 1 }
 0x652   :  { %1695 = vsyncpa [#allocation3 + $0x1], 1 }

</bundles_post_ra>
